<compile_context>
chip_gen: v6e
topology: v6e:2x2x1
jax: 0.10.0
libtpu: 0.0.40
codegen_flags: <defaults>
</compile_context>

<pallas_src>
import functools

import jax
import jax.numpy as jnp
from jax.experimental import pallas as pl
from jax.experimental.pallas import tpu as pltpu

_LANES = 128
_SUBLANES = 8
_DEFAULT_BLOCK_ROWS = 2048  # 2048 x 128 x 4 B = 1 MiB per f32 tile


def _row_tiling(total_elems, max_block_rows):
    """Pick (block_rows, rows_padded) for a lane-dense [rows, 128] layout."""
    rows = pl.cdiv(total_elems, _LANES)
    rows8 = pl.cdiv(rows, _SUBLANES) * _SUBLANES
    block_rows = max(_SUBLANES, (min(max_block_rows, rows8) // _SUBLANES) * _SUBLANES)
    rows_padded = pl.cdiv(rows8, block_rows) * block_rows
    return block_rows, rows_padded


def _to_lane_dense(flat, rows_padded):
    """[L] -> [rows_padded, 128] with zero padding (free reshape when L % 128 == 0)."""
    pad = rows_padded * _LANES - flat.shape[0]
    if pad:
        flat = jnp.pad(flat, (0, pad))
    return flat.reshape(rows_padded, _LANES)


# ---------------------------------------------------------------------------
# Single recurrent step
# ---------------------------------------------------------------------------
def _output_neuron_step_kernel(x_ref, mem_ref, new_mem_ref, spikes_ref, *, beta, factor):
    mem = mem_ref[...]
    new_mem_ref[...] = (beta * mem + factor * x_ref[...]).astype(new_mem_ref.dtype)
    # Spike nonlinearity forward: heaviside(old_mem - 1)  (matches the module)
    spikes_ref[...] = (mem - 1.0 > 0.0).astype(spikes_ref.dtype)


@functools.partial(jax.jit, static_argnames=("beta", "factor", "block_rows"))
def output_neuron_forward(x, mem, *, beta, factor, block_rows=_DEFAULT_BLOCK_ROWS):
    """One OutputNeuron step.  x, mem: [B, N] float32.

    Returns (new_mem, {'mem': new_mem, 'spikes': spikes}) like the PyTorch module.
    """
    B, N = x.shape
    L = B * N
    bm, rows_padded = _row_tiling(L, block_rows)

    x2 = _to_lane_dense(x.reshape(-1), rows_padded)
    m2 = _to_lane_dense(mem.reshape(-1), rows_padded)

    spec = pl.BlockSpec((bm, _LANES), lambda i: (i, 0))
    new_mem2, spikes2 = pl.pallas_call(
        functools.partial(_output_neuron_step_kernel, beta=beta, factor=factor),
        out_shape=(
            jax.ShapeDtypeStruct((rows_padded, _LANES), x.dtype),  # new_mem
            jax.ShapeDtypeStruct((rows_padded, _LANES), x.dtype),  # spikes
        ),
        grid=(rows_padded // bm,),
        in_specs=[spec, spec],
        out_specs=(spec, spec),
        # In-place state update: mem input buffer reused for new_mem output.
        input_output_aliases={1: 0},
        compiler_params=pltpu.CompilerParams(dimension_semantics=("parallel",)),
    )(x2, m2)

    new_mem = new_mem2.reshape(-1)[:L].reshape(B, N)
    spikes = spikes2.reshape(-1)[:L].reshape(B, N)
    return new_mem, {"mem": new_mem, "spikes": spikes}


# ---------------------------------------------------------------------------
# Time-fused sequence (mem carried in VMEM scratch across the time axis)
# ---------------------------------------------------------------------------
def _output_neuron_scan_kernel(x_ref, mem0_ref, mem_seq_ref, spk_seq_ref, mem_sc,
                               *, beta, factor):
    t = pl.program_id(1)

    @pl.when(t == 0)
    def _():
        mem_sc[...] = mem0_ref[...].astype(jnp.float32)

    mem_prev = mem_sc[...]
    new_mem = beta * mem_prev + factor * x_ref[0].astype(jnp.float32)
    mem_sc[...] = new_mem
    mem_seq_ref[0] = new_mem.astype(mem_seq_ref.dtype)
    spk_seq_ref[0] = (mem_prev - 1.0 > 0.0).astype(spk_seq_ref.dtype)


@functools.partial(jax.jit, static_argnames=("beta", "factor", "block_rows"))
def output_neuron_scan(xs, mem0, *, beta, factor, block_rows=_DEFAULT_BLOCK_ROWS):
    """Runs T OutputNeuron steps in a single fused kernel.

    xs: [T, B, N], mem0: [B, N].
    Returns (mem_seq [T,B,N], spikes_seq [T,B,N], final_state dict).
    """
    T, B, N = xs.shape
    L = B * N
    bm, rows_padded = _row_tiling(L, block_rows)
    pad = rows_padded * _LANES - L

    xs_flat = xs.reshape(T, L)
    if pad:
        xs_flat = jnp.pad(xs_flat, ((0, 0), (0, pad)))
    xs3 = xs_flat.reshape(T, rows_padded, _LANES)
    m2 = _to_lane_dense(mem0.reshape(-1), rows_padded)

    x_spec = pl.BlockSpec((1, bm, _LANES), lambda i, t: (t, i, 0))
    m0_spec = pl.BlockSpec((bm, _LANES), lambda i, t: (i, 0))
    out_spec = pl.BlockSpec((1, bm, _LANES), lambda i, t: (t, i, 0))

    mem_seq3, spk_seq3 = pl.pallas_call(
        functools.partial(_output_neuron_scan_kernel, beta=beta, factor=factor),
        out_shape=(
            jax.ShapeDtypeStruct((T, rows_padded, _LANES), xs.dtype),  # mem per step
            jax.ShapeDtypeStruct((T, rows_padded, _LANES), xs.dtype),  # spikes per step
        ),
        grid=(rows_padded // bm, T),
        in_specs=[x_spec, m0_spec],
        out_specs=(out_spec, out_spec),
        scratch_shapes=[pltpu.VMEM((bm, _LANES), jnp.float32)],
        compiler_params=pltpu.CompilerParams(
            dimension_semantics=("parallel", "arbitrary")),
    )(xs3, m2)

    mem_seq = mem_seq3.reshape(T, rows_padded * _LANES)[:, :L].reshape(T, B, N)
    spk_seq = spk_seq3.reshape(T, rows_padded * _LANES)[:, :L].reshape(T, B, N)
    final_state = {"mem": mem_seq[-1], "spikes": spk_seq[-1]}
    return mem_seq, spk_seq, final_state


# ---------------------------------------------------------------------------
def get_initial_state(initial_mem, batch_size, size):
    """Mirrors OutputNeuron.get_initial_state (plain JAX glue)."""
    mem0 = jnp.broadcast_to(initial_mem, (batch_size, size))
    spikes0 = (mem0 - 1.0 > 0.0).astype(jnp.float32)
    return {"mem": mem0, "spikes": spikes0}


if __name__ == "__main__":
    # Module hyperparameters (deterministic, in-script).
    size = 32
    batch = 2
    seq = 8
    params = {
        "target_rate": 0.02,
        "BETA": 0.9,
        "1-beta": "improved",  # factor = sqrt(1 - beta^2)
        "SPIKE_FN": "bellec",
    }
    beta = params["BETA"]
    factor = (1.0 - beta ** 2) ** 0.5

    # Parameter: initial_mem is zeros([size]) in the module's __init__.
    initial_mem = jnp.zeros((size,), dtype=jnp.float32)

    # Deterministic example inputs.
    key = jax.random.PRNGKey(0)
    kx, kh, ks = jax.random.split(key, 3)
    x = jax.random.normal(kx, (batch, size), dtype=jnp.float32)
    h = get_initial_state(initial_mem, batch, size)
    # Non-trivial membrane state so the spike function fires on some units.
    mem = h["mem"] + 2.0 * jax.random.uniform(kh, (batch, size), dtype=jnp.float32)

    # --- single step ---
    out, new_h = output_neuron_forward(x, mem, beta=beta, factor=factor)
    jax.block_until_ready((out, new_h["mem"], new_h["spikes"]))

    ref_new_mem = beta * mem + factor * x
    ref_spikes = (mem - 1.0 > 0.0).astype(jnp.float32)
    assert jnp.allclose(out, ref_new_mem, atol=1e-6)
    assert jnp.allclose(new_h["mem"], ref_new_mem, atol=1e-6)
    assert jnp.array_equal(new_h["spikes"], ref_spikes)

    # --- time-fused scan ---
    xs = jax.random.normal(ks, (seq, batch, size), dtype=jnp.float32)
    mem_seq, spk_seq, last_h = output_neuron_scan(xs, mem, beta=beta, factor=factor)
    jax.block_until_ready((mem_seq, spk_seq, last_h["mem"], last_h["spikes"]))

    m = mem
    ref_mems, ref_spks = [], []
    for t in range(seq):
        ref_spks.append((m - 1.0 > 0.0).astype(jnp.float32))
        m = beta * m + factor * xs[t]
        ref_mems.append(m)
    ref_mems = jnp.stack(ref_mems)
    ref_spks = jnp.stack(ref_spks)
    assert jnp.allclose(mem_seq, ref_mems, atol=1e-5)
    assert jnp.array_equal(spk_seq, ref_spks)
    assert jnp.allclose(last_h["mem"], ref_mems[-1], atol=1e-5)
    assert jnp.array_equal(last_h["spikes"], ref_spks[-1])

    print("KERNEL_OK")
</pallas_src>

<mosaic_0001>
module attributes {stable_mosaic.version = 11 : i64} {
  func.func @_output_neuron_step_kernel(%arg0: i32, %arg1: memref<8x128xf32, #tpu.memory_space<vmem>>, %arg2: memref<8x128xf32, #tpu.memory_space<vmem>>, %arg3: memref<8x128xf32, #tpu.memory_space<vmem>>, %arg4: memref<8x128xf32, #tpu.memory_space<vmem>>) attributes {dimension_semantics = [#tpu.dimension_semantics<parallel>], iteration_bounds = array<i64: 1>, scalar_prefetch = 0 : i64, scratch_operands = 0 : i64, tpu.core_type = #tpu.core_type<tc>, window_params = [{transform_indices = @transform_0, window_bounds = array<i64: 8, 128>}, {transform_indices = @transform_1, window_bounds = array<i64: 8, 128>}, {transform_indices = @transform_2, window_bounds = array<i64: 8, 128>}, {transform_indices = @transform_3, window_bounds = array<i64: 8, 128>}]} {
    %c0 = arith.constant 0 : index
    %c0_0 = arith.constant 0 : index
    %0 = vector.load %arg2[%c0, %c0_0] : memref<8x128xf32, #tpu.memory_space<vmem>>, vector<8x128xf32>
    %cst = arith.constant 0.899999976 : f32
    %1 = vector.broadcast %cst : f32 to vector<8x128xf32>
    %2 = arith.mulf %1, %0 : vector<8x128xf32>
    %c0_1 = arith.constant 0 : index
    %c0_2 = arith.constant 0 : index
    %3 = vector.load %arg1[%c0_1, %c0_2] : memref<8x128xf32, #tpu.memory_space<vmem>>, vector<8x128xf32>
    %cst_3 = arith.constant 0.4358899 : f32
    %4 = vector.broadcast %cst_3 : f32 to vector<8x128xf32>
    %5 = arith.mulf %4, %3 : vector<8x128xf32>
    %6 = arith.addf %2, %5 : vector<8x128xf32>
    %c0_4 = arith.constant 0 : index
    %c0_5 = arith.constant 0 : index
    %7 = vector.load %arg3[%c0_4, %c0_5] : memref<8x128xf32, #tpu.memory_space<vmem>>, vector<8x128xf32>
    tpu.vector_store %arg3[%c0_4, %c0_5], %6 {strides = array<i32>} : memref<8x128xf32, #tpu.memory_space<vmem>>, vector<8x128xf32>,
    %cst_6 = arith.constant 1.000000e+00 : f32
    %8 = vector.broadcast %cst_6 : f32 to vector<8x128xf32>
    %9 = arith.subf %0, %8 : vector<8x128xf32>
    %cst_7 = arith.constant 0.000000e+00 : f32
    %10 = vector.broadcast %cst_7 : f32 to vector<8x128xf32>
    %11 = arith.cmpf ogt, %9, %10 : vector<8x128xf32>
    %12 = arith.extui %11 : vector<8x128xi1> to vector<8x128xi32>
    %13 = arith.sitofp %12 : vector<8x128xi32> to vector<8x128xf32>
    %c0_8 = arith.constant 0 : index
    %c0_9 = arith.constant 0 : index
    %14 = vector.load %arg4[%c0_8, %c0_9] : memref<8x128xf32, #tpu.memory_space<vmem>>, vector<8x128xf32>
    tpu.vector_store %arg4[%c0_8, %c0_9], %13 {strides = array<i32>} : memref<8x128xf32, #tpu.memory_space<vmem>>, vector<8x128xf32>,
    return
  }
  func.func @transform_0(%arg0: i32) -> (i32, i32) {
    %c0_i32 = arith.constant 0 : i32
    %c0_i32_0 = arith.constant 0 : i32
    return %arg0, %c0_i32 : i32, i32
  }
  func.func @transform_1(%arg0: i32) -> (i32, i32) {
    %c0_i32 = arith.constant 0 : i32
    %c0_i32_0 = arith.constant 0 : i32
    return %arg0, %c0_i32 : i32, i32
  }
  func.func @transform_2(%arg0: i32) -> (i32, i32) {
    %c0_i32 = arith.constant 0 : i32
    %c0_i32_0 = arith.constant 0 : i32
    return %arg0, %c0_i32 : i32, i32
  }
  func.func @transform_3(%arg0: i32) -> (i32, i32) {
    %c0_i32 = arith.constant 0 : i32
    %c0_i32_0 = arith.constant 0 : i32
    return %arg0, %c0_i32 : i32, i32
  }
}

</mosaic_0001>

<bundles_post_ra>
// kernel: output_neuron_forward.1
= control target key start
LH: loop header
LB: loop body
LE: loop exit
PB: predicated region body
PF: predicated region fallthrough
CT: control target
= control target key end

     0   :  { %v35_v6 = vmov 0.0   ;;  %s68_s0 = inlined_call_operand.vmem [shape: f32[8,128], index: 0, kind: input, shape index: {}]   ;;  %s69_s1 = inlined_call_operand.vmem [shape: f32[8,128], index: 1, kind: input, shape index: {}, may-alias: {1,2}]   ;;  %s70_s2 = inlined_call_operand.vmem [shape: f32[8,128], index: 2, kind: output, shape index: {0}, may-alias: {1,2}]   ;;  %s71_s3 = inlined_call_operand.vmem [shape: f32[8,128], index: 3, kind: output, shape index: {1}]  }
   0x1   :  { %v13_v0 = vld [vmem:[%s69_s1] sm:$0xff] }
   0x2   :  { %v15_v1 = vld [vmem:[%s68_s0] sm:$0xff]  ;;  %v14_v2 = vmul.f32 0.9, %v13_v0  ;;  %v32_v4 = vadd.f32 -1.0, %v13_v0 }
   0x3   :  { %v16_v3 = vmul.f32 0.4358899, %v15_v1 }
   0x4   :  { %vm20_vm0 = vcmp.gt.f32.partialorder %v32_v4, 0.0 }
   0x5   :  { %v17_v5 = vadd.f32 %v16_v3, %v14_v2  ;;  %v33_v7 = vsel %vm20_vm0, 1.0, %v35_v6 }
   0x6   :  { %23 = vst [vmem:[%s71_s3] sm:$0xff] %v33_v7 }
   0x7   :  { %18 = vst [vmem:[%s70_s2] sm:$0xff] %v17_v5 }

</bundles_post_ra>
